<compile_context>
chip_gen: v5e
topology: v5e:2x2
jax: 0.10.0
libtpu: 0.0.40
codegen_flags: <defaults>
</compile_context>

<pallas_src>
import jax
import jax.numpy as jnp
from jax import lax
from jax.experimental import pallas as pl
from jax.experimental.pallas import tpu as pltpu


# ----------------------------------------------------------------------------
# Fused DB2 Pallas kernel (one batch element per grid step)
# ----------------------------------------------------------------------------
def _db2_fused_kernel(xd_ref, zd_ref, s_ref, bax_ref, baz_ref, bb_ref,
                      bsc_ref, b2a_ref, b2b_ref, aff_ref, o_ref):
    """Ref shapes (lane-dense, channels packed into lanes with W):
      xd_ref  : (1, H, W*Ci)    bf16   x            in (h, w*Ci+ci) layout
      zd_ref  : (1, H, W*Co)    bf16   upsampled z  in (h, w*Co+co) layout
      s_ref   : (2, H, H)       bf16   [S_down, S_up] row-shift matrices
      bax_ref : (3, W*Ci, W*Co) bf16   conv_a weight, x part (banded, per dy)
      baz_ref : (3, W*Co, W*Co) bf16   conv_a weight, z part
      bb_ref  : (3, W*Co, W*Co) bf16   conv_b weight
      bsc_ref : (W*Co, W*Co)    bf16   1x1 shortcut (block-diagonal)
      b2a_ref : (3, W*Co, W*Co) bf16   conv2_a weight
      b2b_ref : (3, W*Co, W*Co) bf16   conv2_b weight
      aff_ref : (9, W*Co)       f32    folded BN scale/shift rows + shortcut bias
      o_ref   : (1, H, W*Co)    f32    output (same lane-dense layout)
    """
    f32, bf16 = jnp.float32, jnp.bfloat16
    s_dn = s_ref[0]          # rows shifted down by one (zero top row)
    s_up = s_ref[1]          # rows shifted up by one   (zero bottom row)

    def shift_rows(d, s):
        # exact: s is a 0/1 sub/super-diagonal matrix, d is bf16
        return jnp.dot(s, d, preferred_element_type=f32).astype(bf16)

    def conv3x3(d, b_ref):
        # d: (H, W*Cin) bf16 ; b_ref: (3, W*Cin, W*Co) banded weights per dy
        acc = jnp.dot(shift_rows(d, s_dn), b_ref[0], preferred_element_type=f32)
        acc += jnp.dot(d, b_ref[1], preferred_element_type=f32)
        acc += jnp.dot(shift_rows(d, s_up), b_ref[2], preferred_element_type=f32)
        return acc

    def bn_relu(acc, i):
        scale = aff_ref[2 * i:2 * i + 1, :]
        shift = aff_ref[2 * i + 1:2 * i + 2, :]
        return jnp.maximum(acc * scale + shift, 0.0)

    xD = xd_ref[0]           # (H, W*Ci) bf16
    zD = zd_ref[0]           # (H, W*Co) bf16

    # p = self.conv(cat(x, z)) : the concat is realised as split weights
    h = bn_relu(conv3x3(xD, bax_ref) + conv3x3(zD, baz_ref), 0)
    p = bn_relu(conv3x3(h.astype(bf16), bb_ref), 1)

    # p = p + self.short_cut(z)
    p = p + jnp.dot(zD, bsc_ref[...], preferred_element_type=f32) + aff_ref[8:9, :]

    # p2 = self.conv2(p); p = p + p2
    h2 = bn_relu(conv3x3(p.astype(bf16), b2a_ref), 2)
    p2 = bn_relu(conv3x3(h2.astype(bf16), b2b_ref), 3)

    o_ref[0] = (p + p2).astype(o_ref.dtype)


# ----------------------------------------------------------------------------
# Weight packing: conv -> banded / block-diagonal matmul weights (wrapper-side)
# ----------------------------------------------------------------------------
def _conv3x3_band_matrices(w_hwio, W):
    """(3, 3, Cin, Cout) -> (3, W*Cin, W*Cout) banded matmul weights.

    With x in the lane-dense (H, W*Cin) layout:
      conv3x3_pad1(x)[h, w*Cout+co] = sum_dy (row_shift_dy(x) @ B[dy])[h, w*Cout+co]
    which reproduces a stride-1, padding-1 cross-correlation (PyTorch Conv2d).
    """
    KH, KW, Cin, Cout = w_hwio.shape
    eye_w = jnp.eye(W, dtype=w_hwio.dtype)
    full = jnp.zeros((KH, (W + KW - 1) * Cin, W * Cout), w_hwio.dtype)
    for dx in range(KW):
        blk = jnp.einsum('wv,kio->kwivo', eye_w, w_hwio[:, dx])
        blk = blk.reshape(KH, W * Cin, W * Cout)
        full = full + jnp.pad(blk, ((0, 0), (dx * Cin, (KW - 1 - dx) * Cin), (0, 0)))
    # Drop rows that would multiply the (all-zero) left/right padding columns.
    return full[:, Cin:(W + 1) * Cin, :]


def _conv1x1_block_diag(w_io, W):
    """(Cin, Cout) -> (W*Cin, W*Cout) block-diagonal 1x1-conv matmul weight."""
    Cin, Cout = w_io.shape
    eye_w = jnp.eye(W, dtype=w_io.dtype)
    return jnp.einsum('wv,io->wivo', eye_w, w_io).reshape(W * Cin, W * Cout)


def prepare_db2_params(params, H, W, inplanes):
    """Pack raw DB2 parameters into kernel-ready (bf16) matmul weights."""
    bf16 = jnp.bfloat16
    wa, sa, ha = params['conv_a']
    wb, sb, hb = params['conv_b']
    w2a, s2a, h2a = params['conv2_a']
    w2b, s2b, h2b = params['conv2_b']
    wsc, bsc_bias = params['short_cut']

    return {
        'bax': _conv3x3_band_matrices(wa[:, :, :inplanes, :], W).astype(bf16),
        'baz': _conv3x3_band_matrices(wa[:, :, inplanes:, :], W).astype(bf16),
        'bb': _conv3x3_band_matrices(wb, W).astype(bf16),
        'b2a': _conv3x3_band_matrices(w2a, W).astype(bf16),
        'b2b': _conv3x3_band_matrices(w2b, W).astype(bf16),
        'bsc': _conv1x1_block_diag(wsc, W).astype(bf16),
        'aff': jnp.stack([jnp.tile(v, W) for v in
                          (sa, ha, sb, hb, s2a, h2a, s2b, h2b, bsc_bias)]
                         ).astype(jnp.float32),
        'shift': jnp.stack([jnp.eye(H, k=-1), jnp.eye(H, k=1)]).astype(bf16),
    }


# ----------------------------------------------------------------------------
# Bilinear upsample (align_corners=True), separable matrix form (XLA glue)
# ----------------------------------------------------------------------------
def _interp_matrix(out_size, in_size):
    if in_size == 1:
        return jnp.ones((out_size, 1), jnp.float32)
    denom = max(out_size - 1, 1)
    coords = jnp.arange(out_size, dtype=jnp.float32) * (in_size - 1) / denom
    i0 = jnp.clip(jnp.floor(coords), 0, in_size - 1).astype(jnp.int32)
    i1 = jnp.clip(i0 + 1, 0, in_size - 1)
    w1 = coords - i0.astype(jnp.float32)
    w0 = 1.0 - w1
    return (w0[:, None] * jax.nn.one_hot(i0, in_size, dtype=jnp.float32)
            + w1[:, None] * jax.nn.one_hot(i1, in_size, dtype=jnp.float32))


def bilinear_upsample_align_corners(z, H, W):
    """z: (N, Hz, Wz, C) NHWC -> (N, H, W, C)."""
    _, Hz, Wz, _ = z.shape
    Ah = _interp_matrix(H, Hz)
    Aw = _interp_matrix(W, Wz)
    t = jnp.einsum('hp,npwc->nhwc', Ah, z)
    return jnp.einsum('wq,nhqc->nhwc', Aw, t)


# ----------------------------------------------------------------------------
# DB2 forward (single fused pallas_call)
# ----------------------------------------------------------------------------
def db2_forward(packed, x_nchw, z_nchw):
    x = jnp.transpose(x_nchw, (0, 2, 3, 1))      # (N, H, W, Ci)
    z = jnp.transpose(z_nchw, (0, 2, 3, 1))      # (N, Hz, Wz, Co)
    N, H, W, Ci = x.shape
    Co = z.shape[-1]
    WC = W * Co

    # z = F.interpolate(z, size=x.size()[2:], mode='bilinear', align_corners=True)
    # (kept as XLA glue; could also be fused in-kernel as two small matmuls)
    z_up = bilinear_upsample_align_corners(z, H, W)

    # lane-dense bf16 activation slabs: (N, H, W*C)
    xd = x.reshape(N, H, W * Ci).astype(jnp.bfloat16)
    zd = z_up.reshape(N, H, WC).astype(jnp.bfloat16)

    out = pl.pallas_call(
        _db2_fused_kernel,
        out_shape=jax.ShapeDtypeStruct((N, H, WC), jnp.float32),
        grid=(N,),
        in_specs=[
            pl.BlockSpec((1, H, W * Ci), lambda n: (n, 0, 0)),   # xd
            pl.BlockSpec((1, H, WC), lambda n: (n, 0, 0)),       # zd
            pl.BlockSpec((2, H, H), lambda n: (0, 0, 0)),        # shift mats
            pl.BlockSpec((3, W * Ci, WC), lambda n: (0, 0, 0)),  # bax
            pl.BlockSpec((3, WC, WC), lambda n: (0, 0, 0)),      # baz
            pl.BlockSpec((3, WC, WC), lambda n: (0, 0, 0)),      # bb
            pl.BlockSpec((WC, WC), lambda n: (0, 0)),            # bsc
            pl.BlockSpec((3, WC, WC), lambda n: (0, 0, 0)),      # b2a
            pl.BlockSpec((3, WC, WC), lambda n: (0, 0, 0)),      # b2b
            pl.BlockSpec((9, WC), lambda n: (0, 0)),             # aff
        ],
        out_specs=pl.BlockSpec((1, H, WC), lambda n: (n, 0, 0)),
        compiler_params=pltpu.CompilerParams(
            dimension_semantics=("parallel",)),
    )(xd, zd, packed['shift'], packed['bax'], packed['baz'], packed['bb'],
      packed['bsc'], packed['b2a'], packed['b2b'], packed['aff'])

    p = out.reshape(N, H, W, Co).transpose(0, 3, 1, 2)   # back to NCHW
    return p, p


# ----------------------------------------------------------------------------
# Pure-JAX reference (same bf16 operand quantization points as the kernel)
# ----------------------------------------------------------------------------
def _q(a):
    return a.astype(jnp.bfloat16).astype(jnp.float32)


def db2_reference(params, x_nchw, z_nchw):
    x = jnp.transpose(x_nchw, (0, 2, 3, 1))
    z = jnp.transpose(z_nchw, (0, 2, 3, 1))
    _, H, W, _ = x.shape
    zu = bilinear_upsample_align_corners(z, H, W)

    def conv_bn_relu(inp, wsh):
        w, scale, shift = wsh
        y = lax.conv_general_dilated(
            _q(inp), _q(w), window_strides=(1, 1), padding='SAME',
            dimension_numbers=('NHWC', 'HWIO', 'NHWC'))
        return jnp.maximum(y * scale + shift, 0.0)

    xz = jnp.concatenate([x, zu], axis=-1)
    h = conv_bn_relu(xz, params['conv_a'])
    p = conv_bn_relu(h, params['conv_b'])
    wsc, bsc = params['short_cut']
    p = p + (jnp.einsum('nhwc,cd->nhwd', _q(zu), _q(wsc)) + bsc)
    h2 = conv_bn_relu(p, params['conv2_a'])
    p2 = conv_bn_relu(h2, params['conv2_b'])
    out = jnp.transpose(p + p2, (0, 3, 1, 2))
    return out, out


# ----------------------------------------------------------------------------
# Parameter construction (kaiming fan_in + zero bias, BN folded at init stats)
# ----------------------------------------------------------------------------
def make_conv3x3_params(key, cin, cout):
    fan_in = cin * 9
    w = jax.random.normal(key, (3, 3, cin, cout), jnp.float32) * jnp.sqrt(2.0 / fan_in)
    bias = jnp.zeros((cout,), jnp.float32)
    gamma = jnp.ones((cout,), jnp.float32)
    beta = jnp.zeros((cout,), jnp.float32)
    mean = jnp.zeros((cout,), jnp.float32)
    var = jnp.ones((cout,), jnp.float32)
    eps = 1e-5
    scale = gamma / jnp.sqrt(var + eps)
    shift = beta + (bias - mean) * scale
    return w, scale, shift


def make_conv1x1_params(key, cin, cout):
    w = jax.random.normal(key, (cin, cout), jnp.float32) * jnp.sqrt(2.0 / cin)
    b = jnp.zeros((cout,), jnp.float32)
    return w, b


if __name__ == "__main__":
    inplanes, outplanes = 4, 8
    N, H, W = 2, 16, 16
    Hz, Wz = 8, 8

    key = jax.random.PRNGKey(0)
    kx, kz, k1, k2, k3, k4, k5 = jax.random.split(key, 7)

    # PyTorch-layout (NCHW) inputs
    x = jax.random.normal(kx, (N, inplanes, H, W), jnp.float32)
    z = jax.random.normal(kz, (N, outplanes, Hz, Wz), jnp.float32)

    params = {
        'conv_a': make_conv3x3_params(k1, inplanes + outplanes, outplanes),
        'conv_b': make_conv3x3_params(k2, outplanes, outplanes),
        'conv2_a': make_conv3x3_params(k3, outplanes, outplanes),
        'conv2_b': make_conv3x3_params(k4, outplanes, outplanes),
        'short_cut': make_conv1x1_params(k5, outplanes, outplanes),
    }

    packed = prepare_db2_params(params, H, W, inplanes)
    fwd = jax.jit(db2_forward)
    p1, p2 = fwd(packed, x, z)
    jax.block_until_ready((p1, p2))
    assert p1.shape == (N, outplanes, H, W)
    assert p2.shape == (N, outplanes, H, W)

    # correctness check against a pure-JAX reference with matching quantization
    r1, _ = jax.jit(db2_reference)(params, x, z)
    err = float(jnp.max(jnp.abs(p1 - r1)))
    assert err < 1e-2, f"max abs diff vs reference too large: {err}"

    print("KERNEL_OK")
</pallas_src>

<mosaic_0001>
module attributes {stable_mosaic.version = 11 : i64} {
  func.func @_db2_fused_kernel(%arg0: i32, %arg1: memref<1x16x64xbf16, #tpu.memory_space<vmem>>, %arg2: memref<1x16x128xbf16, #tpu.memory_space<vmem>>, %arg3: memref<2x16x16xbf16, #tpu.memory_space<vmem>>, %arg4: memref<3x64x128xbf16, #tpu.memory_space<vmem>>, %arg5: memref<3x128x128xbf16, #tpu.memory_space<vmem>>, %arg6: memref<3x128x128xbf16, #tpu.memory_space<vmem>>, %arg7: memref<128x128xbf16, #tpu.memory_space<vmem>>, %arg8: memref<3x128x128xbf16, #tpu.memory_space<vmem>>, %arg9: memref<3x128x128xbf16, #tpu.memory_space<vmem>>, %arg10: memref<9x128xf32, #tpu.memory_space<vmem>>, %arg11: memref<1x16x128xf32, #tpu.memory_space<vmem>>) attributes {dimension_semantics = [#tpu.dimension_semantics<parallel>], iteration_bounds = array<i64: 2>, scalar_prefetch = 0 : i64, scratch_operands = 0 : i64, tpu.core_type = #tpu.core_type<tc>, window_params = [{transform_indices = @transform_0, window_bounds = array<i64: 1, 16, 64>}, {transform_indices = @transform_1, window_bounds = array<i64: 1, 16, 128>}, {pipeline_mode = #tpu.pipeline_mode<synchronous>, transform_indices = @transform_2, window_bounds = array<i64: 2, 16, 16>}, {pipeline_mode = #tpu.pipeline_mode<synchronous>, transform_indices = @transform_3, window_bounds = array<i64: 3, 64, 128>}, {pipeline_mode = #tpu.pipeline_mode<synchronous>, transform_indices = @transform_4, window_bounds = array<i64: 3, 128, 128>}, {pipeline_mode = #tpu.pipeline_mode<synchronous>, transform_indices = @transform_5, window_bounds = array<i64: 3, 128, 128>}, {pipeline_mode = #tpu.pipeline_mode<synchronous>, transform_indices = @transform_6, window_bounds = array<i64: 128, 128>}, {pipeline_mode = #tpu.pipeline_mode<synchronous>, transform_indices = @transform_7, window_bounds = array<i64: 3, 128, 128>}, {pipeline_mode = #tpu.pipeline_mode<synchronous>, transform_indices = @transform_8, window_bounds = array<i64: 3, 128, 128>}, {pipeline_mode = #tpu.pipeline_mode<synchronous>, transform_indices = @transform_9, window_bounds = array<i64: 9, 128>}, {transform_indices = @transform_10, window_bounds = array<i64: 1, 16, 128>}]} {
    %c0 = arith.constant 0 : index
    %c0_0 = arith.constant 0 : index
    %c0_1 = arith.constant 0 : index
    %0 = vector.load %arg3[%c0, %c0_0, %c0_1] : memref<2x16x16xbf16, #tpu.memory_space<vmem>>, vector<1x16x16xbf16>
    %1 = vector.shape_cast %0 : vector<1x16x16xbf16> to vector<16x16xbf16>
    %c1 = arith.constant 1 : index
    %c0_2 = arith.constant 0 : index
    %c0_3 = arith.constant 0 : index
    %2 = vector.load %arg3[%c1, %c0_2, %c0_3] : memref<2x16x16xbf16, #tpu.memory_space<vmem>>, vector<1x16x16xbf16>
    %3 = vector.shape_cast %2 : vector<1x16x16xbf16> to vector<16x16xbf16>
    %c0_4 = arith.constant 0 : index
    %c0_5 = arith.constant 0 : index
    %c0_6 = arith.constant 0 : index
    %4 = vector.load %arg1[%c0_4, %c0_5, %c0_6] : memref<1x16x64xbf16, #tpu.memory_space<vmem>>, vector<1x16x64xbf16>
    %5 = vector.shape_cast %4 : vector<1x16x64xbf16> to vector<16x64xbf16>
    %c0_7 = arith.constant 0 : index
    %c0_8 = arith.constant 0 : index
    %c0_9 = arith.constant 0 : index
    %6 = vector.load %arg2[%c0_7, %c0_8, %c0_9] : memref<1x16x128xbf16, #tpu.memory_space<vmem>>, vector<1x16x128xbf16>
    %7 = vector.shape_cast %6 : vector<1x16x128xbf16> to vector<16x128xbf16>
    %cst = arith.constant dense<0.000000e+00> : vector<16x64xf32>
    %8 = tpu.matmul %1, %5, %cst {dimension_numbers = #tpu.dot_dimension_numbers<[1], [0], [0], [1], [0, 0, 1, 1], [], []>} : vector<16x16xbf16>, vector<16x64xbf16>, vector<16x64xf32> -> vector<16x64xf32>
    %9 = arith.truncf %8 : vector<16x64xf32> to vector<16x64xbf16>
    %c0_10 = arith.constant 0 : index
    %c0_11 = arith.constant 0 : index
    %c0_12 = arith.constant 0 : index
    %10 = vector.load %arg4[%c0_10, %c0_11, %c0_12] : memref<3x64x128xbf16, #tpu.memory_space<vmem>>, vector<1x64x128xbf16>
    %11 = vector.shape_cast %10 : vector<1x64x128xbf16> to vector<64x128xbf16>
    %cst_13 = arith.constant dense<0.000000e+00> : vector<16x128xf32>
    %12 = tpu.matmul %9, %11, %cst_13 {dimension_numbers = #tpu.dot_dimension_numbers<[1], [0], [0], [1], [0, 0, 1, 1], [], []>} : vector<16x64xbf16>, vector<64x128xbf16>, vector<16x128xf32> -> vector<16x128xf32>
    %c1_14 = arith.constant 1 : index
    %c0_15 = arith.constant 0 : index
    %c0_16 = arith.constant 0 : index
    %13 = vector.load %arg4[%c1_14, %c0_15, %c0_16] : memref<3x64x128xbf16, #tpu.memory_space<vmem>>, vector<1x64x128xbf16>
    %14 = vector.shape_cast %13 : vector<1x64x128xbf16> to vector<64x128xbf16>
    %cst_17 = arith.constant dense<0.000000e+00> : vector<16x128xf32>
    %15 = tpu.matmul %5, %14, %cst_17 {dimension_numbers = #tpu.dot_dimension_numbers<[1], [0], [0], [1], [0, 0, 1, 1], [], []>} : vector<16x64xbf16>, vector<64x128xbf16>, vector<16x128xf32> -> vector<16x128xf32>
    %16 = arith.addf %12, %15 : vector<16x128xf32>
    %cst_18 = arith.constant dense<0.000000e+00> : vector<16x64xf32>
    %17 = tpu.matmul %3, %5, %cst_18 {dimension_numbers = #tpu.dot_dimension_numbers<[1], [0], [0], [1], [0, 0, 1, 1], [], []>} : vector<16x16xbf16>, vector<16x64xbf16>, vector<16x64xf32> -> vector<16x64xf32>
    %18 = arith.truncf %17 : vector<16x64xf32> to vector<16x64xbf16>
    %c2 = arith.constant 2 : index
    %c0_19 = arith.constant 0 : index
    %c0_20 = arith.constant 0 : index
    %19 = vector.load %arg4[%c2, %c0_19, %c0_20] : memref<3x64x128xbf16, #tpu.memory_space<vmem>>, vector<1x64x128xbf16>
    %20 = vector.shape_cast %19 : vector<1x64x128xbf16> to vector<64x128xbf16>
    %cst_21 = arith.constant dense<0.000000e+00> : vector<16x128xf32>
    %21 = tpu.matmul %18, %20, %cst_21 {dimension_numbers = #tpu.dot_dimension_numbers<[1], [0], [0], [1], [0, 0, 1, 1], [], []>} : vector<16x64xbf16>, vector<64x128xbf16>, vector<16x128xf32> -> vector<16x128xf32>
    %22 = arith.addf %16, %21 : vector<16x128xf32>
    %cst_22 = arith.constant dense<0.000000e+00> : vector<16x128xf32>
    %23 = tpu.matmul %1, %7, %cst_22 {dimension_numbers = #tpu.dot_dimension_numbers<[1], [0], [0], [1], [0, 0, 1, 1], [], []>} : vector<16x16xbf16>, vector<16x128xbf16>, vector<16x128xf32> -> vector<16x128xf32>
    %24 = arith.truncf %23 : vector<16x128xf32> to vector<16x128xbf16>
    %c0_23 = arith.constant 0 : index
    %c0_24 = arith.constant 0 : index
    %c0_25 = arith.constant 0 : index
    %25 = vector.load %arg5[%c0_23, %c0_24, %c0_25] : memref<3x128x128xbf16, #tpu.memory_space<vmem>>, vector<1x128x128xbf16>
    %26 = vector.shape_cast %25 : vector<1x128x128xbf16> to vector<128x128xbf16>
    %cst_26 = arith.constant dense<0.000000e+00> : vector<16x128xf32>
    %27 = tpu.matmul %24, %26, %cst_26 {dimension_numbers = #tpu.dot_dimension_numbers<[1], [0], [0], [1], [0, 0, 1, 1], [], []>} : vector<16x128xbf16>, vector<128x128xbf16>, vector<16x128xf32> -> vector<16x128xf32>
    %c1_27 = arith.constant 1 : index
    %c0_28 = arith.constant 0 : index
    %c0_29 = arith.constant 0 : index
    %28 = vector.load %arg5[%c1_27, %c0_28, %c0_29] : memref<3x128x128xbf16, #tpu.memory_space<vmem>>, vector<1x128x128xbf16>
    %29 = vector.shape_cast %28 : vector<1x128x128xbf16> to vector<128x128xbf16>
    %cst_30 = arith.constant dense<0.000000e+00> : vector<16x128xf32>
    %30 = tpu.matmul %7, %29, %cst_30 {dimension_numbers = #tpu.dot_dimension_numbers<[1], [0], [0], [1], [0, 0, 1, 1], [], []>} : vector<16x128xbf16>, vector<128x128xbf16>, vector<16x128xf32> -> vector<16x128xf32>
    %31 = arith.addf %27, %30 : vector<16x128xf32>
    %cst_31 = arith.constant dense<0.000000e+00> : vector<16x128xf32>
    %32 = tpu.matmul %3, %7, %cst_31 {dimension_numbers = #tpu.dot_dimension_numbers<[1], [0], [0], [1], [0, 0, 1, 1], [], []>} : vector<16x16xbf16>, vector<16x128xbf16>, vector<16x128xf32> -> vector<16x128xf32>
    %33 = arith.truncf %32 : vector<16x128xf32> to vector<16x128xbf16>
    %c2_32 = arith.constant 2 : index
    %c0_33 = arith.constant 0 : index
    %c0_34 = arith.constant 0 : index
    %34 = vector.load %arg5[%c2_32, %c0_33, %c0_34] : memref<3x128x128xbf16, #tpu.memory_space<vmem>>, vector<1x128x128xbf16>
    %35 = vector.shape_cast %34 : vector<1x128x128xbf16> to vector<128x128xbf16>
    %cst_35 = arith.constant dense<0.000000e+00> : vector<16x128xf32>
    %36 = tpu.matmul %33, %35, %cst_35 {dimension_numbers = #tpu.dot_dimension_numbers<[1], [0], [0], [1], [0, 0, 1, 1], [], []>} : vector<16x128xbf16>, vector<128x128xbf16>, vector<16x128xf32> -> vector<16x128xf32>
    %37 = arith.addf %31, %36 : vector<16x128xf32>
    %38 = arith.addf %22, %37 : vector<16x128xf32>
    %c0_36 = arith.constant 0 : index
    %c0_37 = arith.constant 0 : index
    %39 = vector.load %arg10[%c0_36, %c0_37] : memref<9x128xf32, #tpu.memory_space<vmem>>, vector<1x128xf32>
    %c1_38 = arith.constant 1 : index
    %c0_39 = arith.constant 0 : index
    %40 = vector.load %arg10[%c1_38, %c0_39] : memref<9x128xf32, #tpu.memory_space<vmem>>, vector<1x128xf32>
    %41 = vector.broadcast %39 : vector<1x128xf32> to vector<16x128xf32>
    %42 = arith.mulf %38, %41 : vector<16x128xf32>
    %43 = vector.broadcast %40 : vector<1x128xf32> to vector<16x128xf32>
    %44 = arith.addf %42, %43 : vector<16x128xf32>
    %cst_40 = arith.constant 0.000000e+00 : f32
    %45 = vector.broadcast %cst_40 : f32 to vector<16x128xf32>
    %46 = arith.maximumf %44, %45 : vector<16x128xf32>
    %47 = arith.truncf %46 : vector<16x128xf32> to vector<16x128xbf16>
    %cst_41 = arith.constant dense<0.000000e+00> : vector<16x128xf32>
    %48 = tpu.matmul %1, %47, %cst_41 {dimension_numbers = #tpu.dot_dimension_numbers<[1], [0], [0], [1], [0, 0, 1, 1], [], []>} : vector<16x16xbf16>, vector<16x128xbf16>, vector<16x128xf32> -> vector<16x128xf32>
    %49 = arith.truncf %48 : vector<16x128xf32> to vector<16x128xbf16>
    %c0_42 = arith.constant 0 : index
    %c0_43 = arith.constant 0 : index
    %c0_44 = arith.constant 0 : index
    %50 = vector.load %arg6[%c0_42, %c0_43, %c0_44] : memref<3x128x128xbf16, #tpu.memory_space<vmem>>, vector<1x128x128xbf16>
    %51 = vector.shape_cast %50 : vector<1x128x128xbf16> to vector<128x128xbf16>
    %cst_45 = arith.constant dense<0.000000e+00> : vector<16x128xf32>
    %52 = tpu.matmul %49, %51, %cst_45 {dimension_numbers = #tpu.dot_dimension_numbers<[1], [0], [0], [1], [0, 0, 1, 1], [], []>} : vector<16x128xbf16>, vector<128x128xbf16>, vector<16x128xf32> -> vector<16x128xf32>
    %c1_46 = arith.constant 1 : index
    %c0_47 = arith.constant 0 : index
    %c0_48 = arith.constant 0 : index
    %53 = vector.load %arg6[%c1_46, %c0_47, %c0_48] : memref<3x128x128xbf16, #tpu.memory_space<vmem>>, vector<1x128x128xbf16>
    %54 = vector.shape_cast %53 : vector<1x128x128xbf16> to vector<128x128xbf16>
    %cst_49 = arith.constant dense<0.000000e+00> : vector<16x128xf32>
    %55 = tpu.matmul %47, %54, %cst_49 {dimension_numbers = #tpu.dot_dimension_numbers<[1], [0], [0], [1], [0, 0, 1, 1], [], []>} : vector<16x128xbf16>, vector<128x128xbf16>, vector<16x128xf32> -> vector<16x128xf32>
    %56 = arith.addf %52, %55 : vector<16x128xf32>
    %cst_50 = arith.constant dense<0.000000e+00> : vector<16x128xf32>
    %57 = tpu.matmul %3, %47, %cst_50 {dimension_numbers = #tpu.dot_dimension_numbers<[1], [0], [0], [1], [0, 0, 1, 1], [], []>} : vector<16x16xbf16>, vector<16x128xbf16>, vector<16x128xf32> -> vector<16x128xf32>
    %58 = arith.truncf %57 : vector<16x128xf32> to vector<16x128xbf16>
    %c2_51 = arith.constant 2 : index
    %c0_52 = arith.constant 0 : index
    %c0_53 = arith.constant 0 : index
    %59 = vector.load %arg6[%c2_51, %c0_52, %c0_53] : memref<3x128x128xbf16, #tpu.memory_space<vmem>>, vector<1x128x128xbf16>
    %60 = vector.shape_cast %59 : vector<1x128x128xbf16> to vector<128x128xbf16>
    %cst_54 = arith.constant dense<0.000000e+00> : vector<16x128xf32>
    %61 = tpu.matmul %58, %60, %cst_54 {dimension_numbers = #tpu.dot_dimension_numbers<[1], [0], [0], [1], [0, 0, 1, 1], [], []>} : vector<16x128xbf16>, vector<128x128xbf16>, vector<16x128xf32> -> vector<16x128xf32>
    %62 = arith.addf %56, %61 : vector<16x128xf32>
    %c2_55 = arith.constant 2 : index
    %c0_56 = arith.constant 0 : index
    %63 = vector.load %arg10[%c2_55, %c0_56] : memref<9x128xf32, #tpu.memory_space<vmem>>, vector<1x128xf32>
    %c3 = arith.constant 3 : index
    %c0_57 = arith.constant 0 : index
    %64 = vector.load %arg10[%c3, %c0_57] : memref<9x128xf32, #tpu.memory_space<vmem>>, vector<1x128xf32>
    %65 = vector.broadcast %63 : vector<1x128xf32> to vector<16x128xf32>
    %66 = arith.mulf %62, %65 : vector<16x128xf32>
    %67 = vector.broadcast %64 : vector<1x128xf32> to vector<16x128xf32>
    %68 = arith.addf %66, %67 : vector<16x128xf32>
    %cst_58 = arith.constant 0.000000e+00 : f32
    %69 = vector.broadcast %cst_58 : f32 to vector<16x128xf32>
    %70 = arith.maximumf %68, %69 : vector<16x128xf32>
    %c0_59 = arith.constant 0 : index
    %c0_60 = arith.constant 0 : index
    %71 = vector.load %arg7[%c0_59, %c0_60] : memref<128x128xbf16, #tpu.memory_space<vmem>>, vector<128x128xbf16>
    %cst_61 = arith.constant dense<0.000000e+00> : vector<16x128xf32>
    %72 = tpu.matmul %7, %71, %cst_61 {dimension_numbers = #tpu.dot_dimension_numbers<[1], [0], [0], [1], [0, 0, 1, 1], [], []>} : vector<16x128xbf16>, vector<128x128xbf16>, vector<16x128xf32> -> vector<16x128xf32>
    %73 = arith.addf %70, %72 : vector<16x128xf32>
    %c8 = arith.constant 8 : index
    %c0_62 = arith.constant 0 : index
    %74 = vector.load %arg10[%c8, %c0_62] : memref<9x128xf32, #tpu.memory_space<vmem>>, vector<1x128xf32>
    %75 = vector.broadcast %74 : vector<1x128xf32> to vector<16x128xf32>
    %76 = arith.addf %73, %75 : vector<16x128xf32>
    %77 = arith.truncf %76 : vector<16x128xf32> to vector<16x128xbf16>
    %cst_63 = arith.constant dense<0.000000e+00> : vector<16x128xf32>
    %78 = tpu.matmul %1, %77, %cst_63 {dimension_numbers = #tpu.dot_dimension_numbers<[1], [0], [0], [1], [0, 0, 1, 1], [], []>} : vector<16x16xbf16>, vector<16x128xbf16>, vector<16x128xf32> -> vector<16x128xf32>
    %79 = arith.truncf %78 : vector<16x128xf32> to vector<16x128xbf16>
    %c0_64 = arith.constant 0 : index
    %c0_65 = arith.constant 0 : index
    %c0_66 = arith.constant 0 : index
    %80 = vector.load %arg8[%c0_64, %c0_65, %c0_66] : memref<3x128x128xbf16, #tpu.memory_space<vmem>>, vector<1x128x128xbf16>
    %81 = vector.shape_cast %80 : vector<1x128x128xbf16> to vector<128x128xbf16>
    %cst_67 = arith.constant dense<0.000000e+00> : vector<16x128xf32>
    %82 = tpu.matmul %79, %81, %cst_67 {dimension_numbers = #tpu.dot_dimension_numbers<[1], [0], [0], [1], [0, 0, 1, 1], [], []>} : vector<16x128xbf16>, vector<128x128xbf16>, vector<16x128xf32> -> vector<16x128xf32>
    %c1_68 = arith.constant 1 : index
    %c0_69 = arith.constant 0 : index
    %c0_70 = arith.constant 0 : index
    %83 = vector.load %arg8[%c1_68, %c0_69, %c0_70] : memref<3x128x128xbf16, #tpu.memory_space<vmem>>, vector<1x128x128xbf16>
    %84 = vector.shape_cast %83 : vector<1x128x128xbf16> to vector<128x128xbf16>
    %cst_71 = arith.constant dense<0.000000e+00> : vector<16x128xf32>
    %85 = tpu.matmul %77, %84, %cst_71 {dimension_numbers = #tpu.dot_dimension_numbers<[1], [0], [0], [1], [0, 0, 1, 1], [], []>} : vector<16x128xbf16>, vector<128x128xbf16>, vector<16x128xf32> -> vector<16x128xf32>
    %86 = arith.addf %82, %85 : vector<16x128xf32>
    %cst_72 = arith.constant dense<0.000000e+00> : vector<16x128xf32>
    %87 = tpu.matmul %3, %77, %cst_72 {dimension_numbers = #tpu.dot_dimension_numbers<[1], [0], [0], [1], [0, 0, 1, 1], [], []>} : vector<16x16xbf16>, vector<16x128xbf16>, vector<16x128xf32> -> vector<16x128xf32>
    %88 = arith.truncf %87 : vector<16x128xf32> to vector<16x128xbf16>
    %c2_73 = arith.constant 2 : index
    %c0_74 = arith.constant 0 : index
    %c0_75 = arith.constant 0 : index
    %89 = vector.load %arg8[%c2_73, %c0_74, %c0_75] : memref<3x128x128xbf16, #tpu.memory_space<vmem>>, vector<1x128x128xbf16>
    %90 = vector.shape_cast %89 : vector<1x128x128xbf16> to vector<128x128xbf16>
    %cst_76 = arith.constant dense<0.000000e+00> : vector<16x128xf32>
    %91 = tpu.matmul %88, %90, %cst_76 {dimension_numbers = #tpu.dot_dimension_numbers<[1], [0], [0], [1], [0, 0, 1, 1], [], []>} : vector<16x128xbf16>, vector<128x128xbf16>, vector<16x128xf32> -> vector<16x128xf32>
    %92 = arith.addf %86, %91 : vector<16x128xf32>
    %c4 = arith.constant 4 : index
    %c0_77 = arith.constant 0 : index
    %93 = vector.load %arg10[%c4, %c0_77] : memref<9x128xf32, #tpu.memory_space<vmem>>, vector<1x128xf32>
    %c5 = arith.constant 5 : index
    %c0_78 = arith.constant 0 : index
    %94 = vector.load %arg10[%c5, %c0_78] : memref<9x128xf32, #tpu.memory_space<vmem>>, vector<1x128xf32>
    %95 = vector.broadcast %93 : vector<1x128xf32> to vector<16x128xf32>
    %96 = arith.mulf %92, %95 : vector<16x128xf32>
    %97 = vector.broadcast %94 : vector<1x128xf32> to vector<16x128xf32>
    %98 = arith.addf %96, %97 : vector<16x128xf32>
    %cst_79 = arith.constant 0.000000e+00 : f32
    %99 = vector.broadcast %cst_79 : f32 to vector<16x128xf32>
    %100 = arith.maximumf %98, %99 : vector<16x128xf32>
    %101 = arith.truncf %100 : vector<16x128xf32> to vector<16x128xbf16>
    %cst_80 = arith.constant dense<0.000000e+00> : vector<16x128xf32>
    %102 = tpu.matmul %1, %101, %cst_80 {dimension_numbers = #tpu.dot_dimension_numbers<[1], [0], [0], [1], [0, 0, 1, 1], [], []>} : vector<16x16xbf16>, vector<16x128xbf16>, vector<16x128xf32> -> vector<16x128xf32>
    %103 = arith.truncf %102 : vector<16x128xf32> to vector<16x128xbf16>
    %c0_81 = arith.constant 0 : index
    %c0_82 = arith.constant 0 : index
    %c0_83 = arith.constant 0 : index
    %104 = vector.load %arg9[%c0_81, %c0_82, %c0_83] : memref<3x128x128xbf16, #tpu.memory_space<vmem>>, vector<1x128x128xbf16>
    %105 = vector.shape_cast %104 : vector<1x128x128xbf16> to vector<128x128xbf16>
    %cst_84 = arith.constant dense<0.000000e+00> : vector<16x128xf32>
    %106 = tpu.matmul %103, %105, %cst_84 {dimension_numbers = #tpu.dot_dimension_numbers<[1], [0], [0], [1], [0, 0, 1, 1], [], []>} : vector<16x128xbf16>, vector<128x128xbf16>, vector<16x128xf32> -> vector<16x128xf32>
    %c1_85 = arith.constant 1 : index
    %c0_86 = arith.constant 0 : index
    %c0_87 = arith.constant 0 : index
    %107 = vector.load %arg9[%c1_85, %c0_86, %c0_87] : memref<3x128x128xbf16, #tpu.memory_space<vmem>>, vector<1x128x128xbf16>
    %108 = vector.shape_cast %107 : vector<1x128x128xbf16> to vector<128x128xbf16>
    %cst_88 = arith.constant dense<0.000000e+00> : vector<16x128xf32>
    %109 = tpu.matmul %101, %108, %cst_88 {dimension_numbers = #tpu.dot_dimension_numbers<[1], [0], [0], [1], [0, 0, 1, 1], [], []>} : vector<16x128xbf16>, vector<128x128xbf16>, vector<16x128xf32> -> vector<16x128xf32>
    %110 = arith.addf %106, %109 : vector<16x128xf32>
    %cst_89 = arith.constant dense<0.000000e+00> : vector<16x128xf32>
    %111 = tpu.matmul %3, %101, %cst_89 {dimension_numbers = #tpu.dot_dimension_numbers<[1], [0], [0], [1], [0, 0, 1, 1], [], []>} : vector<16x16xbf16>, vector<16x128xbf16>, vector<16x128xf32> -> vector<16x128xf32>
    %112 = arith.truncf %111 : vector<16x128xf32> to vector<16x128xbf16>
    %c2_90 = arith.constant 2 : index
    %c0_91 = arith.constant 0 : index
    %c0_92 = arith.constant 0 : index
    %113 = vector.load %arg9[%c2_90, %c0_91, %c0_92] : memref<3x128x128xbf16, #tpu.memory_space<vmem>>, vector<1x128x128xbf16>
    %114 = vector.shape_cast %113 : vector<1x128x128xbf16> to vector<128x128xbf16>
    %cst_93 = arith.constant dense<0.000000e+00> : vector<16x128xf32>
    %115 = tpu.matmul %112, %114, %cst_93 {dimension_numbers = #tpu.dot_dimension_numbers<[1], [0], [0], [1], [0, 0, 1, 1], [], []>} : vector<16x128xbf16>, vector<128x128xbf16>, vector<16x128xf32> -> vector<16x128xf32>
    %116 = arith.addf %110, %115 : vector<16x128xf32>
    %c6 = arith.constant 6 : index
    %c0_94 = arith.constant 0 : index
    %117 = vector.load %arg10[%c6, %c0_94] : memref<9x128xf32, #tpu.memory_space<vmem>>, vector<1x128xf32>
    %c7 = arith.constant 7 : index
    %c0_95 = arith.constant 0 : index
    %118 = vector.load %arg10[%c7, %c0_95] : memref<9x128xf32, #tpu.memory_space<vmem>>, vector<1x128xf32>
    %119 = vector.broadcast %117 : vector<1x128xf32> to vector<16x128xf32>
    %120 = arith.mulf %116, %119 : vector<16x128xf32>
    %121 = vector.broadcast %118 : vector<1x128xf32> to vector<16x128xf32>
    %122 = arith.addf %120, %121 : vector<16x128xf32>
    %cst_96 = arith.constant 0.000000e+00 : f32
    %123 = vector.broadcast %cst_96 : f32 to vector<16x128xf32>
    %124 = arith.maximumf %122, %123 : vector<16x128xf32>
    %125 = arith.addf %76, %124 : vector<16x128xf32>
    %c0_97 = arith.constant 0 : index
    %c0_98 = arith.constant 0 : index
    %c0_99 = arith.constant 0 : index
    %126 = vector.load %arg11[%c0_97, %c0_98, %c0_99] : memref<1x16x128xf32, #tpu.memory_space<vmem>>, vector<1x16x128xf32>
    %127 = vector.shape_cast %126 : vector<1x16x128xf32> to vector<16x128xf32>
    %128 = vector.shape_cast %125 : vector<16x128xf32> to vector<1x16x128xf32>
    tpu.vector_store %arg11[%c0_97, %c0_98, %c0_99], %128 {strides = array<i32>} : memref<1x16x128xf32, #tpu.memory_space<vmem>>, vector<1x16x128xf32>,
    return
  }
  func.func @transform_0(%arg0: i32) -> (i32, i32, i32) {
    %c0_i32 = arith.constant 0 : i32
    %c0_i32_0 = arith.constant 0 : i32
    %c0_i32_1 = arith.constant 0 : i32
    return %arg0, %c0_i32, %c0_i32_0 : i32, i32, i32
  }
  func.func @transform_1(%arg0: i32) -> (i32, i32, i32) {
    %c0_i32 = arith.constant 0 : i32
    %c0_i32_0 = arith.constant 0 : i32
    %c0_i32_1 = arith.constant 0 : i32
    return %arg0, %c0_i32, %c0_i32_0 : i32, i32, i32
  }
  func.func @transform_2(%arg0: i32) -> (i32, i32, i32) {
    %c0_i32 = arith.constant 0 : i32
    %c0_i32_0 = arith.constant 0 : i32
    %c0_i32_1 = arith.constant 0 : i32
    %c0_i32_2 = arith.constant 0 : i32
    return %c0_i32, %c0_i32_0, %c0_i32_1 : i32, i32, i32
  }
  func.func @transform_3(%arg0: i32) -> (i32, i32, i32) {
    %c0_i32 = arith.constant 0 : i32
    %c0_i32_0 = arith.constant 0 : i32
    %c0_i32_1 = arith.constant 0 : i32
    %c0_i32_2 = arith.constant 0 : i32
    return %c0_i32, %c0_i32_0, %c0_i32_1 : i32, i32, i32
  }
  func.func @transform_4(%arg0: i32) -> (i32, i32, i32) {
    %c0_i32 = arith.constant 0 : i32
    %c0_i32_0 = arith.constant 0 : i32
    %c0_i32_1 = arith.constant 0 : i32
    %c0_i32_2 = arith.constant 0 : i32
    return %c0_i32, %c0_i32_0, %c0_i32_1 : i32, i32, i32
  }
  func.func @transform_5(%arg0: i32) -> (i32, i32, i32) {
    %c0_i32 = arith.constant 0 : i32
    %c0_i32_0 = arith.constant 0 : i32
    %c0_i32_1 = arith.constant 0 : i32
    %c0_i32_2 = arith.constant 0 : i32
    return %c0_i32, %c0_i32_0, %c0_i32_1 : i32, i32, i32
  }
  func.func @transform_6(%arg0: i32) -> (i32, i32) {
    %c0_i32 = arith.constant 0 : i32
    %c0_i32_0 = arith.constant 0 : i32
    %c0_i32_1 = arith.constant 0 : i32
    return %c0_i32, %c0_i32_0 : i32, i32
  }
  func.func @transform_7(%arg0: i32) -> (i32, i32, i32) {
    %c0_i32 = arith.constant 0 : i32
    %c0_i32_0 = arith.constant 0 : i32
    %c0_i32_1 = arith.constant 0 : i32
    %c0_i32_2 = arith.constant 0 : i32
    return %c0_i32, %c0_i32_0, %c0_i32_1 : i32, i32, i32
  }
  func.func @transform_8(%arg0: i32) -> (i32, i32, i32) {
    %c0_i32 = arith.constant 0 : i32
    %c0_i32_0 = arith.constant 0 : i32
    %c0_i32_1 = arith.constant 0 : i32
    %c0_i32_2 = arith.constant 0 : i32
    return %c0_i32, %c0_i32_0, %c0_i32_1 : i32, i32, i32
  }
  func.func @transform_9(%arg0: i32) -> (i32, i32) {
    %c0_i32 = arith.constant 0 : i32
    %c0_i32_0 = arith.constant 0 : i32
    %c0_i32_1 = arith.constant 0 : i32
    return %c0_i32, %c0_i32_0 : i32, i32
  }
  func.func @transform_10(%arg0: i32) -> (i32, i32, i32) {
    %c0_i32 = arith.constant 0 : i32
    %c0_i32_0 = arith.constant 0 : i32
    %c0_i32_1 = arith.constant 0 : i32
    return %arg0, %c0_i32, %c0_i32_0 : i32, i32, i32
  }
}

</mosaic_0001>

<bundles_post_ra>
// kernel: db2_forward.1
= control target key start
LH: loop header
LB: loop body
LE: loop exit
PB: predicated region body
PF: predicated region fallthrough
CT: control target
= control target key end

     0   :  { %s2728_s13 = smov 0   ;;  %s3174_s0 = inlined_call_operand.vmem [shape: bf16[2,16,64], index: 0, kind: input, shape index: {}]   ;;  %s3175_s1 = inlined_call_operand.vmem [shape: bf16[2,16,128], index: 1, kind: input, shape index: {}]   ;;  %s3176_s2 = inlined_call_operand.vmem [shape: bf16[2,16,16], index: 2, kind: input, shape index: {}]   ;;  %s3177_s3 = inlined_call_operand.vmem [shape: bf16[3,64,128], index: 3, kind: input, shape index: {}]   ;;  %s3178_s4 = inlined_call_operand.vmem [shape: bf16[3,128,128], index: 4, kind: input, shape index: {}]   ;;  %s3179_s5 = inlined_call_operand.vmem [shape: bf16[3,128,128], index: 5, kind: input, shape index: {}]   ;;  %s3180_s6 = inlined_call_operand.vmem [shape: bf16[128,128], index: 6, kind: input, shape index: {}]   ;;  %s3181_s7 = inlined_call_operand.vmem [shape: bf16[3,128,128], index: 7, kind: input, shape index: {}]   ;;  %s3182_s8 = inlined_call_operand.vmem [shape: bf16[3,128,128], index: 8, kind: input, shape index: {}]   ;;  %s3183_s9 = inlined_call_operand.vmem [shape: f32[9,128], index: 9, kind: input, shape index: {}]   ;;  %s3184_s10 = inlined_call_operand.vmem [shape: f32[2,16,128], index: 10, kind: output, shape index: {}]  }
   0x1 LB: > { %s1873_s14 = sadd.s32 4294967295, %s2671_s13   ;;  %p1877_p0 = scmp.ge.s32.totalorder %s2671_s13, 1  ;;  %s2671_s13 = sphi %s2728_s13, %s20_s13  }
   0x2   : > { %p322_p1 = scmp.lt.s32.totalorder %s2671_s13, 3 }
   0x4   : > { %p323_p2 = pnand %p1877_p0, %p322_p1 }
   0x5   : > { %p365_p3 = scmp.lt.s32.totalorder (!%p323_p2), %s1873_s14, 1 }
   0x6   : > { %326 = sbr.rel (%p323_p2) target bundleno = 1372 (0x55c), region = 60 }
   0xb   : > { %v2535_v0 = vld [vmem:[%s3177_s3 + $0x18] sm:$0xff]  ;;  %s3186_s14 = smov (!%p365_p3, %s1873_s14), 1  ;;  %v2748_v2 = vld [vmem:[%s3176_s2] sm:$0xff]  ;;  %v2753_v3 = vld [vmem:[%s3176_s2 + $0x8] sm:$0xff]  ;;  %vm401_vm0 = vcmask 130048   ;;  %vm461_vm1 = vcmask 523264  }
   0xc   : > { %510 = vmatpush.bf16.msra.mxu2 %v2535_v0  ;;  %s2525_s17 = sshll.u32 %s3186_s14, 3  ;;  %v2534_v4 = vld [vmem:[%s3177_s3 + $0x10] sm:$0xff]  ;;  %v2539_v5 = vld [vmem:[%s3177_s3 + $0x38] sm:$0xff]  ;;  %v2533_v7 = vld [vmem:[%s3177_s3 + $0x8] sm:$0xff] }
   0xd   : > { %s369_s20 = scalar_lea.vmem %s3174_s0, %s2525_s17  ;;  %v2543_v6 = vld [vmem:[%s3177_s3 + $0x58] sm:$0xff]  ;;  %s374_s18 = scalar_lea.vmem %s3175_s1, %s2525_s17  ;;  %v2538_v8 = vld [vmem:[%s3177_s3 + $0x30] sm:$0xff]  ;;  %v2532_v11 = vld [vmem:[%s3177_s3] sm:$0xff] }
   0xe   : > { %v2530_v1 = vld [vmem:[%s369_s20] sm:$0xff]  ;;  %583 = vmatpush.bf16.msra.mxu0 %v2543_v6  ;;  %v2542_v9 = vld [vmem:[%s3177_s3 + $0x50] sm:$0xff]  ;;  %v2537_v12 = vld [vmem:[%s3177_s3 + $0x28] sm:$0xff]  ;;  %s2527_s17 = sshll.u32 %s3186_s14, 4 }
   0xf   : > { %412 = vmatpush.bf16.msra.mxu1 %v2530_v1  ;;  %535 = vmatpush.bf16.msra.mxu3 %v2530_v1  ;;  %v2780_v10 = vld [vmem:[%s374_s18] sm:$0xff]  ;;  %v2541_v13 = vld [vmem:[%s3177_s3 + $0x48] sm:$0xff]  ;;  %v2551_v17 = vld [vmem:[%s3178_s4 + $0x38] sm:$0xff]  ;;  %s379_s27 = scalar_lea.vmem %s3184_s10, %s2527_s17 }
  0x10   : > { %511 = vmatpush.bf16.msra.mxu2 %v2534_v4  ;;  %v2536_v14 = vld [vmem:[%s3177_s3 + $0x20] sm:$0xff]  ;;  %v2559_v18 = vld [vmem:[%s3178_s4 + $0x78] sm:$0xff]  ;;  %v2550_v19 = vld [vmem:[%s3178_s4 + $0x30] sm:$0xff] }
  0x11   : > { %v2540_v15 = vld [vmem:[%s3177_s3 + $0x40] sm:$0xff]  ;;  %v2558_v20 = vld [vmem:[%s3178_s4 + $0x70] sm:$0xff]  ;;  %v2567_v21 = vld [vmem:[%s3178_s4 + $0xb8] sm:$0xff] }
  0x12   : > { %1894 = vmatmul.msk.bf16.vlgmr.msra.gmra.mxu1 %vm401_vm0, %v2748_v2  ;;  %1941 = vmatmul.msk.bf16.vlgmr.msra.gmra.mxu3 %vm401_vm0, %v2753_v3  ;;  %v2557_v23 = vld [vmem:[%s3178_s4 + $0x68] sm:$0xff]  ;;  %v2556_v27 = vld [vmem:[%s3178_s4 + $0x60] sm:$0xff]  ;;  %v2547_v31 = vld [vmem:[%s3178_s4 + $0x18] sm:$0xff] }
  0x13   : > { %469 = vmatpush.bf16.msrb.mxu1 %v2539_v5  ;;  %584 = vmatpush.bf16.msra.mxu0 %v2542_v9  ;;  %v2549_v25 = vld [vmem:[%s3178_s4 + $0x28] sm:$0xff]  ;;  %v2548_v28 = vld [vmem:[%s3178_s4 + $0x20] sm:$0xff]  ;;  %v2546_v32 = vld [vmem:[%s3178_s4 + $0x10] sm:$0xff] }
  0x14   : > { %512 = vmatpush.bf16.msra.mxu2 %v2533_v7  ;;  %608 = vmatpush.bf16.msrb.mxu3 %v2780_v10  ;;  %v2555_v33 = vld [vmem:[%s3178_s4 + $0x58] sm:$0xff]  ;;  %v2566_v34 = vld [vmem:[%s3178_s4 + $0xb0] sm:$0xff]  ;;  %v2545_v36 = vld [vmem:[%s3178_s4 + $0x8] sm:$0xff] }
  0x15   : > { %v2554_v37 = vld [vmem:[%s3178_s4 + $0x50] sm:$0xff]  ;;  %v2565_v38 = vld [vmem:[%s3178_s4 + $0xa8] sm:$0xff]  ;;  %v2544_v39 = vld [vmem:[%s3178_s4] sm:$0xff] }
  0x16   : > { %v2553_v40 = vld [vmem:[%s3178_s4 + $0x48] sm:$0xff]  ;;  %v2564_v41 = vld [vmem:[%s3178_s4 + $0xa0] sm:$0xff]  ;;  %v2563_v45 = vld [vmem:[%s3178_s4 + $0x98] sm:$0xff] }
  0x17   : > { %470 = vmatpush.bf16.msrb.mxu1 %v2538_v8  ;;  %585 = vmatpush.bf16.msra.mxu0 %v2541_v13  ;;  %v2552_v44 = vld [vmem:[%s3178_s4 + $0x40] sm:$0xff]  ;;  %v2562_v46 = vld [vmem:[%s3178_s4 + $0x90] sm:$0xff]  ;;  %v2561_v47 = vld [vmem:[%s3178_s4 + $0x88] sm:$0xff] }
  0x18   : > { %513 = vmatpush.bf16.msra.mxu2 %v2532_v11  ;;  %853 = vmatpush.bf16.msra.mxu3 %v2567_v21  ;;  %v2560_v48 = vld [vmem:[%s3178_s4 + $0x80] sm:$0xff]  ;;  %v2583_v54 = vld [vmem:[%s3179_s5 + $0x78] sm:$0xff]  ;;  %v2582_v55 = vld [vmem:[%s3179_s5 + $0x70] sm:$0xff] }
  0x19   : > { %v2581_v56 = vld [vmem:[%s3179_s5 + $0x68] sm:$0xff]  ;;  %v2580_v57 = vld [vmem:[%s3179_s5 + $0x60] sm:$0xff]  ;;  %v2579_v58 = vld [vmem:[%s3179_s5 + $0x58] sm:$0xff] }
  0x1a   : > { %v2578_v61 = vld [vmem:[%s3179_s5 + $0x50] sm:$0xff]  ;;  %v2577_v62 = vld [vmem:[%s3179_s5 + $0x48] sm:$0xff]  ;;  %v2576_v63 = vld [vmem:[%s3179_s5 + $0x40] sm:$0xff] }
  0x1b   : > { %471 = vmatpush.bf16.msrb.mxu1 %v2537_v12  ;;  %586 = vmatpush.bf16.msra.mxu0 %v2540_v15 }
  0x1c   : > { %759 = vmatpush.bf16.msrb.mxu2 %v2551_v17  ;;  %854 = vmatpush.bf16.msra.mxu3 %v2566_v34 }
  0x1f   : > { %472 = vmatpush.bf16.msrb.mxu1 %v2536_v14  ;;  %780 = vmatpush.bf16.msrb.mxu0 %v2780_v10 }
  0x20   : > { %760 = vmatpush.bf16.msrb.mxu2 %v2550_v19  ;;  %855 = vmatpush.bf16.msra.mxu3 %v2565_v38  ;;  %v2575_v19 = vld [vmem:[%s3179_s5 + $0x38] sm:$0xff] }
  0x21   : > { %v2599_v38 = vld [vmem:[%s3180_s6 + $0x38] sm:$0xff] }
  0x22   : > { %1971 = vmatmul.msk.bf16.vlgmr.msrb.gmra.mxu3 %vm401_vm0, %v2748_v2  ;;  %1919 = vmatmul.msk.bf16.vlgmr.msrb.gmra.mxu1 %vm461_vm1, %v2530_v1 }
  0x23   : > { %697 = vmatpush.bf16.msra.mxu1 %v2559_v18 }
  0x24   : > { %761 = vmatpush.bf16.msrb.mxu2 %v2549_v25  ;;  %856 = vmatpush.bf16.msra.mxu3 %v2564_v41  ;;  %v2574_v25 = vld [vmem:[%s3179_s5 + $0x30] sm:$0xff] }
  0x25   : > { %v2598_v41 = vld [vmem:[%s3180_s6 + $0x30] sm:$0xff] }
  0x27   : > { %698 = vmatpush.bf16.msra.mxu1 %v2558_v20 }
  0x28   : > { %762 = vmatpush.bf16.msrb.mxu2 %v2548_v28  ;;  %857 = vmatpush.bf16.msra.mxu3 %v2563_v45  ;;  %v2587_v45 = vld [vmem:[%s3179_s5 + $0x98] sm:$0xff] }
  0x2b   : > { %699 = vmatpush.bf16.msra.mxu1 %v2557_v23 }
  0x2c   : > { %763 = vmatpush.bf16.msrb.mxu2 %v2547_v31  ;;  %858 = vmatpush.bf16.msra.mxu3 %v2562_v46  ;;  %v2596_v46 = vld [vmem:[%s3180_s6 + $0x20] sm:$0xff] }
  0x2f   : > { %700 = vmatpush.bf16.msra.mxu1 %v2556_v27 }
  0x30   : > { %764 = vmatpush.bf16.msrb.mxu2 %v2546_v32  ;;  %859 = vmatpush.bf16.msra.mxu3 %v2561_v47  ;;  %v2586_v47 = vld [vmem:[%s3179_s5 + $0x90] sm:$0xff] }
  0x33   : > { %701 = vmatpush.bf16.msra.mxu1 %v2555_v33  ;;  %v2572_v33 = vld [vmem:[%s3179_s5 + $0x20] sm:$0xff] }
  0x34   : > { %765 = vmatpush.bf16.msrb.mxu2 %v2545_v36  ;;  %860 = vmatpush.bf16.msra.mxu3 %v2560_v48  ;;  %v2570_v36 = vld [vmem:[%s3179_s5 + $0x10] sm:$0xff]  ;;  %v2595_v48 = vld [vmem:[%s3180_s6 + $0x18] sm:$0xff] }
  0x37   : > { %702 = vmatpush.bf16.msra.mxu1 %v2554_v37  ;;  %v2590_v37 = vld [vmem:[%s3179_s5 + $0xb0] sm:$0xff] }
  0x38   : > { %766 = vmatpush.bf16.msrb.mxu2 %v2544_v39  ;;  %v2569_v39 = vld [vmem:[%s3179_s5 + $0x8] sm:$0xff] }
  0x3b   : > { %703 = vmatpush.bf16.msra.mxu1 %v2553_v40  ;;  %v2589_v40 = vld [vmem:[%s3179_s5 + $0xa8] sm:$0xff] }
  0x3f   : > { %704 = vmatpush.bf16.msra.mxu1 %v2552_v44  ;;  %v2597_v44 = vld [vmem:[%s3180_s6 + $0x28] sm:$0xff] }
  0x42   : > { %705 = vmatmul.bf16.vlgmr.msra.gmra.mxu1 %v2780_v10 }
  0x43   : > { %978 = vmatpush.bf16.msrb.mxu1 %v2583_v54 }
  0x47   : > { %979 = vmatpush.bf16.msrb.mxu1 %v2582_v55 }
  0x4b   : > { %980 = vmatpush.bf16.msrb.mxu1 %v2581_v56 }
  0x4f   : > { %981 = vmatpush.bf16.msrb.mxu1 %v2580_v57 }
  0x53   : > { %982 = vmatpush.bf16.msrb.mxu1 %v2579_v58 }
  0x57   : > { %983 = vmatpush.bf16.msrb.mxu1 %v2578_v61  ;;  %v2614_v61 = vld [vmem:[%s3181_s7 + $0x70] sm:$0xff] }
  0x5b   : > { %984 = vmatpush.bf16.msrb.mxu1 %v2577_v62  ;;  %v2612_v62 = vld [vmem:[%s3181_s7 + $0x60] sm:$0xff] }
  0x5f   : > { %985 = vmatpush.bf16.msrb.mxu1 %v2576_v63  ;;  %v2611_v63 = vld [vmem:[%s3181_s7 + $0x58] sm:$0xff] }
  0x8f   : > { %v414_v16 = vpop.f32.mrf.mxu1 }
  0x95   : > { %v537_v22 = vpop.f32.mrf.mxu3 }
  0x97   : > { %v416_v24 = vpop.f32.mrf.mxu1 }
  0x98   : > { %v419_v26 = vpack.c.bf16 %v416_v24, %v414_v16  ;;  %v2656_v16 = vld [vmem:[%s3183_s9] ss:$0 sm:$0xff]  ;;  %v2591_v24 = vld [vmem:[%s3179_s5 + $0xb8] sm:$0xff] }
  0x99   : > { %1134 = vmatpush.bf16.msrb.mxu3 %v2591_v24  ;;  %v2623_v24 = vld [vmem:[%s3181_s7 + $0xb8] sm:$0xff] }
  0x9a   : > { %1936 = vmatmul.msk.bf16.vlgmr.msra.gmra.mxu2 %vm461_vm1, %v419_v26 }
  0x9b   : > { %1040 = vmatpush.bf16.msra.mxu2 %v2575_v19 }
  0x9d   : > { %v539_v29 = vpop.f32.mrf.mxu3  ;;  %1135 = vmatpush.bf16.msrb.mxu3 %v2590_v37  ;;  %v2603_v37 = vld [vmem:[%s3181_s7 + $0x18] sm:$0xff] }
  0x9e   : > { %v542_v30 = vpack.c.bf16 %v539_v29, %v537_v22  ;;  %v2657_v22 = vld [vmem:[%s3183_s9 + $0x1] ss:$0 sm:$0xff]  ;;  %v2573_v29 = vld [vmem:[%s3179_s5 + $0x28] sm:$0xff] }
  0x9f   : > { %v474_v59 = vpop.f32.mrf.mxu1  ;;  %1041 = vmatpush.bf16.msra.mxu2 %v2574_v25  ;;  %v2606_v25 = vld [vmem:[%s3181_s7 + $0x30] sm:$0xff] }
  0xa0   : > { %1966 = vmatmul.msk.bf16.vlgmr.msra.gmra.mxu0 %vm461_vm1, %v542_v30 }
  0xa1   : > { %1136 = vmatpush.bf16.msrb.mxu3 %v2589_v40  ;;  %v2601_v40 = vld [vmem:[%s3181_s7 + $0x8] sm:$0xff] }
  0xa3   : > { %1042 = vmatpush.bf16.msra.mxu2 %v2573_v29 }
  0xa5   : > { %v610_v35 = vpop.f32.mrf.mxu3 }
  0xa7   : > { %v476_v0 = vpop.f32.mrf.mxu1  ;;  %1043 = vmatpush.bf16.msra.mxu2 %v2572_v33 }
  0xad   : > { %v612_v42 = vpop.f32.mrf.mxu3 }
  0xae   : > { %v615_v43 = vpack.c.bf16 %v612_v42, %v610_v35  ;;  %v2571_v35 = vld [vmem:[%s3179_s5 + $0x18] sm:$0xff]  ;;  %v2568_v42 = vld [vmem:[%s3179_s5] sm:$0xff] }
  0xaf   : > { %1044 = vmatpush.bf16.msra.mxu2 %v2571_v35  ;;  %v2604_v35 = vld [vmem:[%s3181_s7 + $0x20] sm:$0xff] }
  0xb0   : > { %2052 = vmatmul.msk.bf16.vlgmr.msrb.gmra.mxu0 %vm401_vm0, %v2753_v3  ;;  %767 = vmatmul.bf16.vlgmr.msrb.gmra.mxu2 %v615_v43  ;;  %v2588_v43 = vld [vmem:[%s3179_s5 + $0xa0] sm:$0xff] }
  0xb1   : > { %1137 = vmatpush.bf16.msrb.mxu3 %v2588_v43  ;;  %v2620_v43 = vld [vmem:[%s3181_s7 + $0xa0] sm:$0xff] }
  0xb3   : > { %1045 = vmatpush.bf16.msra.mxu2 %v2570_v36 }
  0xb5   : > { %1138 = vmatpush.bf16.msrb.mxu3 %v2587_v45  ;;  %v2618_v45 = vld [vmem:[%s3181_s7 + $0x90] sm:$0xff] }
  0xb7   : > { %1046 = vmatpush.bf16.msra.mxu2 %v2569_v39  ;;  %v2622_v39 = vld [vmem:[%s3181_s7 + $0xb0] sm:$0xff] }
  0xb9   : > { %1139 = vmatpush.bf16.msrb.mxu3 %v2586_v47  ;;  %v2616_v47 = vld [vmem:[%s3181_s7 + $0x80] sm:$0xff] }
  0xbb   : > { %1047 = vmatpush.bf16.msra.mxu2 %v2568_v42  ;;  %v2600_v42 = vld [vmem:[%s3181_s7] sm:$0xff] }
  0xbf   : > { %v706_v4 = vpop.f32.mrf.mxu1 }
  0xc7   : > { %v708_v12 = vpop.f32.mrf.mxu1 }
 0x11d   : > { %v588_v49 = vpop.f32.mrf.mxu0  ;;  %v515_v60 = vpop.f32.mrf.mxu2 }
 0x11e   : > { %v516_v6 = vadd.f32 %v515_v60, %v474_v59  ;;  %v2615_v60 = vld [vmem:[%s3181_s7 + $0x78] sm:$0xff] }
 0x11f   : > { %1341 = vmatpush.bf16.msrb.mxu2 %v2615_v60  ;;  %v2633_v60 = vld [vmem:[%s3182_s8 + $0x48] sm:$0xff] }
 0x120   : > { %v593_v11 = vadd.f32 %v588_v49, %v516_v6  ;;  %v2585_v49 = vld [vmem:[%s3179_s5 + $0x88] sm:$0xff] }
 0x121   : > { %1140 = vmatpush.bf16.msrb.mxu3 %v2585_v49 }
 0x123   : > { %1342 = vmatpush.bf16.msrb.mxu2 %v2614_v61  ;;  %v2632_v61 = vld [vmem:[%s3182_s8 + $0x40] sm:$0xff] }
 0x125   : > { %v590_v50 = vpop.f32.mrf.mxu0  ;;  %v517_v1 = vpop.f32.mrf.mxu2 }
 0x126   : > { %v518_v14 = vadd.f32 %v517_v1, %v476_v0  ;;  %v2610_v0 = vld [vmem:[%s3181_s7 + $0x50] sm:$0xff]  ;;  %v2609_v1 = vld [vmem:[%s3181_s7 + $0x48] sm:$0xff] }
 0x128   : > { %v594_v20 = vadd.f32 %v590_v50, %v518_v14  ;;  %v2594_v50 = vld [vmem:[%s3180_s6 + $0x10] sm:$0xff] }
 0x12d   : > { %v782_v51 = vpop.f32.mrf.mxu0 }
 0x133   : > { %v768_v5 = vpop.f32.mrf.mxu2 }
 0x134   : > { %v769_v7 = vadd.f32 %v768_v5, %v706_v4  ;;  %v2608_v4 = vld [vmem:[%s3181_s7 + $0x40] sm:$0xff] }
 0x135   : > { %v784_v52 = vpop.f32.mrf.mxu0 }
 0x136   : > { %v787_v53 = vpack.c.bf16 %v784_v52, %v782_v51  ;;  %v2584_v51 = vld [vmem:[%s3179_s5 + $0x80] sm:$0xff]  ;;  %v2593_v52 = vld [vmem:[%s3180_s6 + $0x8] sm:$0xff] }
 0x137   : > { %1141 = vmatpush.bf16.msrb.mxu3 %v2584_v51 }
 0x138   : > { %861 = vmatmul.bf16.vlgmr.msra.gmra.mxu3 %v787_v53  ;;  %v2592_v53 = vld [vmem:[%s3180_s6] sm:$0xff] }
 0x13b   : > { %v770_v13 = vpop.f32.mrf.mxu2 }
 0x13c   : > { %v771_v17 = vadd.f32 %v770_v13, %v708_v12  ;;  %v2659_v13 = vld [vmem:[%s3183_s9 + $0x3] ss:$0 sm:$0xff] }
 0x1bb   : > { %v862_v8 = vpop.f32.mrf.mxu3 }
 0x1bc   : > { %v867_v9 = vadd.f32 %v862_v8, %v769_v7  ;;  %v2658_v8 = vld [vmem:[%s3183_s9 + $0x2] ss:$0 sm:$0xff] }
 0x1be   : > { %v869_v15 = vadd.f32 %v867_v9, %v593_v11 }
 0x1c0   : > { %v874_v21 = vmul.f32 %v2656_v16, %v869_v15 }
 0x1c2   : > { %v877_v27 = vadd.f32 %v2657_v22, %v874_v21  ;;  %v2607_v21 = vld [vmem:[%s3181_s7 + $0x38] sm:$0xff] }
 0x1c3   : > { %v864_v18 = vpop.f32.mrf.mxu3  ;;  %1403 = vmatpush.bf16.msra.mxu3 %v2607_v21 }
 0x1c4   : > { %v868_v23 = vadd.f32 %v864_v18, %v771_v17  ;;  %v879_v31 = vmax.f32 %v877_v27, 0.0 }
 0x1c6   : > { %v870_v26 = vadd.f32 %v868_v23, %v594_v20 }
 0x1c7   : > { %1404 = vmatpush.bf16.msra.mxu3 %v2606_v25  ;;  %v2626_v25 = vld [vmem:[%s3182_s8 + $0x10] sm:$0xff] }
 0x1c8   : > { %v875_v28 = vmul.f32 %v2656_v16, %v870_v26 }
 0x1ca   : > { %v878_v30 = vadd.f32 %v2657_v22, %v875_v28  ;;  %v2660_v28 = vld [vmem:[%s3183_s9 + $0x8] ss:$0 sm:$0xff] }
 0x1cc   : > { %v880_v32 = vmax.f32 %v878_v30, 0.0 }
 0x1ce   : > { %v881_v34 = vpack.c.bf16 %v880_v32, %v879_v31  ;;  %v2605_v31 = vld [vmem:[%s3181_s7 + $0x28] sm:$0xff] }
 0x1cf   : > { %1405 = vmatpush.bf16.msra.mxu3 %v2605_v31  ;;  %v2641_v31 = vld [vmem:[%s3182_s8 + $0x88] sm:$0xff] }
 0x1d0   : > { %889 = vmatpush.bf16.msra.mxu0 %v881_v34  ;;  %986 = vmatmul.bf16.vlgmr.msrb.gmra.mxu1 %v881_v34 }
 0x1d3   : > { %2101 = vmatmul.msk.bf16.vlgmr.msra.gmra.mxu0 %vm401_vm0, %v2748_v2  ;;  %1406 = vmatpush.bf16.msra.mxu3 %v2604_v35 }
 0x1d4   : > { %1061 = vmatpush.bf16.msrb.mxu0 %v881_v34 }
 0x1d7   : > { %1407 = vmatpush.bf16.msra.mxu3 %v2603_v37 }
 0x1d8   : > { %1224 = vmatpush.bf16.msra.mxu0 %v2599_v38  ;;  %v2602_v38 = vld [vmem:[%s3181_s7 + $0x10] sm:$0xff] }
 0x1db   : > { %1408 = vmatpush.bf16.msra.mxu3 %v2602_v38 }
 0x1dc   : > { %1225 = vmatpush.bf16.msra.mxu0 %v2598_v41  ;;  %v2621_v41 = vld [vmem:[%s3181_s7 + $0xa8] sm:$0xff] }
 0x1df   : > { %1409 = vmatpush.bf16.msra.mxu3 %v2601_v40 }
 0x1e0   : > { %1226 = vmatpush.bf16.msra.mxu0 %v2597_v44  ;;  %v2619_v44 = vld [vmem:[%s3181_s7 + $0x98] sm:$0xff] }
 0x1e3   : > { %2182 = vmatmul.msk.bf16.vlgmr.msrb.gmra.mxu0 %vm401_vm0, %v2753_v3  ;;  %1410 = vmatpush.bf16.msra.mxu3 %v2600_v42 }
 0x1e4   : > { %1227 = vmatpush.bf16.msra.mxu0 %v2596_v46  ;;  %v2617_v46 = vld [vmem:[%s3181_s7 + $0x88] sm:$0xff] }
 0x1e8   : > { %1228 = vmatpush.bf16.msra.mxu0 %v2595_v48  ;;  %v2639_v48 = vld [vmem:[%s3182_s8 + $0x78] sm:$0xff] }
 0x1ec   : > { %1229 = vmatpush.bf16.msra.mxu0 %v2594_v50 }
 0x1f0   : > { %1230 = vmatpush.bf16.msra.mxu0 %v2593_v52 }
 0x1f4   : > { %1231 = vmatpush.bf16.msra.mxu0 %v2592_v53 }
 0x1f7   : > { %1232 = vmatmul.bf16.vlgmr.msra.gmra.mxu0 %v2780_v10  ;;  %v2613_v10 = vld [vmem:[%s3181_s7 + $0x68] sm:$0xff] }
 0x1f8   : > { %1343 = vmatpush.bf16.msrb.mxu2 %v2613_v10  ;;  %1497 = vmatpush.bf16.msrb.mxu0 %v2623_v24  ;;  %v2627_v24 = vld [vmem:[%s3182_s8 + $0x18] sm:$0xff] }
 0x1fc   : > { %1344 = vmatpush.bf16.msrb.mxu2 %v2612_v62  ;;  %1498 = vmatpush.bf16.msrb.mxu0 %v2622_v39 }
 0x200   : > { %1345 = vmatpush.bf16.msrb.mxu2 %v2611_v63  ;;  %1499 = vmatpush.bf16.msrb.mxu0 %v2621_v41 }
 0x204   : > { %1346 = vmatpush.bf16.msrb.mxu2 %v2610_v0  ;;  %1500 = vmatpush.bf16.msrb.mxu0 %v2620_v43 }
 0x208   : > { %1347 = vmatpush.bf16.msrb.mxu2 %v2609_v1  ;;  %1501 = vmatpush.bf16.msrb.mxu0 %v2619_v44  ;;  %v2663_v44 = vld [vmem:[%s3183_s9 + $0x6] ss:$0 sm:$0xff] }
 0x20c   : > { %1348 = vmatpush.bf16.msrb.mxu2 %v2608_v4  ;;  %1502 = vmatpush.bf16.msrb.mxu0 %v2618_v45  ;;  %v2661_v4 = vld [vmem:[%s3183_s9 + $0x4] ss:$0 sm:$0xff] }
 0x210   : > { %1503 = vmatpush.bf16.msrb.mxu0 %v2617_v46 }
 0x214   : > { %1504 = vmatpush.bf16.msrb.mxu0 %v2616_v47  ;;  %v2664_v47 = vld [vmem:[%s3183_s9 + $0x7] ss:$0 sm:$0xff] }
 0x24d   : > { %v987_v6 = vpop.f32.mrf.mxu1 }
 0x250   : > { %v891_v54 = vpop.f32.mrf.mxu0 }
 0x255   : > { %v989_v15 = vpop.f32.mrf.mxu1 }
 0x258   : > { %v893_v55 = vpop.f32.mrf.mxu0 }
 0x259   : > { %v896_v56 = vpack.c.bf16 %v893_v55, %v891_v54  ;;  %v2638_v55 = vld [vmem:[%s3182_s8 + $0x70] sm:$0xff] }
 0x25b   : > { %1048 = vmatmul.bf16.vlgmr.msra.gmra.mxu2 %v896_v56  ;;  %v2637_v56 = vld [vmem:[%s3182_s8 + $0x68] sm:$0xff] }
 0x25c   : > { %1620 = vmatpush.bf16.msra.mxu2 %v2639_v48 }
 0x260   : > { %v1063_v57 = vpop.f32.mrf.mxu0  ;;  %1621 = vmatpush.bf16.msra.mxu2 %v2638_v55 }
 0x264   : > { %1622 = vmatpush.bf16.msra.mxu2 %v2637_v56 }
 0x268   : > { %v1065_v58 = vpop.f32.mrf.mxu0 }
 0x269   : > { %v1068_v59 = vpack.c.bf16 %v1065_v58, %v1063_v57  ;;  %v2636_v57 = vld [vmem:[%s3182_s8 + $0x60] sm:$0xff]  ;;  %v2635_v58 = vld [vmem:[%s3182_s8 + $0x58] sm:$0xff] }
 0x26a   : > { %1623 = vmatpush.bf16.msra.mxu2 %v2636_v57 }
 0x26b   : > { %1142 = vmatmul.bf16.vlgmr.msrb.gmra.mxu3 %v1068_v59  ;;  %v2634_v59 = vld [vmem:[%s3182_s8 + $0x50] sm:$0xff] }
 0x26e   : > { %1624 = vmatpush.bf16.msra.mxu2 %v2635_v58 }
 0x272   : > { %1625 = vmatpush.bf16.msra.mxu2 %v2634_v59 }
 0x274   : > { %v1233_v16 = vpop.f32.mrf.mxu0 }
 0x276   : > { %1626 = vmatpush.bf16.msra.mxu2 %v2633_v60 }
 0x27a   : > { %1627 = vmatpush.bf16.msra.mxu2 %v2632_v61 }
 0x27c   : > { %v1235_v30 = vpop.f32.mrf.mxu0 }
 0x2de   : > { %v1049_v5 = vpop.f32.mrf.mxu2 }
 0x2df   : > { %v1050_v7 = vadd.f32 %v1049_v5, %v987_v6 }
 0x2e6   : > { %v1051_v14 = vpop.f32.mrf.mxu2 }
 0x2e7   : > { %v1052_v17 = vadd.f32 %v1051_v14, %v989_v15  ;;  %v2630_v14 = vld [vmem:[%s3182_s8 + $0x30] sm:$0xff] }
 0x2ee   : > { %v1143_v9 = vpop.f32.mrf.mxu3 }
 0x2ef   : > { %v1148_v11 = vadd.f32 %v1143_v9, %v1050_v7  ;;  %v2631_v7 = vld [vmem:[%s3182_s8 + $0x38] sm:$0xff] }
 0x2f0   : > { %1682 = vmatpush.bf16.msrb.mxu3 %v2631_v7 }
 0x2f1   : > { %v1153_v12 = vmul.f32 %v2658_v8, %v1148_v11  ;;  %v2662_v11 = vld [vmem:[%s3183_s9 + $0x5] ss:$0 sm:$0xff] }
 0x2f3   : > { %v1156_v18 = vadd.f32 %v2659_v13, %v1153_v12  ;;  %v2647_v12 = vld [vmem:[%s3182_s8 + $0xb8] sm:$0xff] }
 0x2f4   : > { %1776 = vmatpush.bf16.msra.mxu0 %v2647_v12  ;;  %1683 = vmatpush.bf16.msrb.mxu3 %v2630_v14 }
 0x2f5   : > { %v1158_v22 = vmax.f32 %v1156_v18, 0.0  ;;  %v2629_v18 = vld [vmem:[%s3182_s8 + $0x28] sm:$0xff] }
 0x2f6   : > { %v1145_v19 = vpop.f32.mrf.mxu3 }
 0x2f7   : > { %v1149_v20 = vadd.f32 %v1145_v19, %v1052_v17  ;;  %v1238_v27 = vadd.f32 %v1233_v16, %v1158_v22  ;;  %v2628_v22 = vld [vmem:[%s3182_s8 + $0x20] sm:$0xff] }
 0x2f8   : > { %1684 = vmatpush.bf16.msrb.mxu3 %v2629_v18 }
 0x2f9   : > { %v1154_v23 = vmul.f32 %v2658_v8, %v1149_v20  ;;  %v3031_v33 = vadd.f32 %v2660_v28, %v1238_v27  ;;  %v2625_v27 = vld [vmem:[%s3182_s8 + $0x8] sm:$0xff] }
 0x2fb   : > { %v1157_v26 = vadd.f32 %v2659_v13, %v1154_v23 }
 0x2fc   : > { %1685 = vmatpush.bf16.msrb.mxu3 %v2628_v22 }
 0x2fd   : > { %v1159_v29 = vmax.f32 %v1157_v26, 0.0  ;;  %v2646_v26 = vld [vmem:[%s3182_s8 + $0xb0] sm:$0xff] }
 0x2fe   : > { %1777 = vmatpush.bf16.msra.mxu0 %v2646_v26 }
 0x2ff   : > { %v1239_v32 = vadd.f32 %v1235_v30, %v1159_v29  ;;  %v2643_v29 = vld [vmem:[%s3182_s8 + $0x98] sm:$0xff]  ;;  %v2642_v30 = vld [vmem:[%s3182_s8 + $0x90] sm:$0xff] }
 0x300   : > { %1686 = vmatpush.bf16.msrb.mxu3 %v2627_v24 }
 0x301   : > { %v3033_v34 = vadd.f32 %v2660_v28, %v1239_v32  ;;  %v2644_v28 = vld [vmem:[%s3182_s8 + $0xa0] sm:$0xff] }
 0x302   : > { %v2640_v32 = vld [vmem:[%s3182_s8 + $0x80] sm:$0xff] }
 0x303   : > { %v1244_v36 = vpack.c.bf16 %v3033_v34, %v3031_v33 }
 0x304   : > { %1687 = vmatpush.bf16.msrb.mxu3 %v2626_v25 }
 0x305   : > { %1252 = vmatpush.bf16.msra.mxu1 %v1244_v36  ;;  %1349 = vmatmul.bf16.vlgmr.msrb.gmra.mxu2 %v1244_v36 }
 0x308   : > { %2263 = vmatmul.msk.bf16.vlgmr.msra.gmra.mxu1 %vm401_vm0, %v2748_v2  ;;  %1688 = vmatpush.bf16.msrb.mxu3 %v2625_v27 }
 0x309   : > { %1424 = vmatpush.bf16.msrb.mxu1 %v1244_v36 }
 0x318   : > { %2344 = vmatmul.msk.bf16.vlgmr.msrb.gmra.mxu1 %vm401_vm0, %v2753_v3 }
 0x385   : > { %v1254_v49 = vpop.f32.mrf.mxu1 }
 0x388   : > { %v1350_v62 = vpop.f32.mrf.mxu2 }
 0x38d   : > { %v1256_v50 = vpop.f32.mrf.mxu1 }
 0x38e   : > { %v1259_v51 = vpack.c.bf16 %v1256_v50, %v1254_v49 }
 0x390   : > { %1411 = vmatmul.bf16.vlgmr.msra.gmra.mxu3 %v1259_v51  ;;  %v1352_v6 = vpop.f32.mrf.mxu2 }
 0x395   : > { %v1426_v52 = vpop.f32.mrf.mxu1 }
 0x39d   : > { %v1428_v53 = vpop.f32.mrf.mxu1 }
 0x39e   : > { %v1431_v54 = vpack.c.bf16 %v1428_v53, %v1426_v52 }
 0x3a0   : > { %1505 = vmatmul.bf16.vlgmr.msrb.gmra.mxu0 %v1431_v54 }
 0x413   : > { %v1412_v10 = vpop.f32.mrf.mxu3 }
 0x414   : > { %v1413_v0 = vadd.f32 %v1412_v10, %v1350_v62 }
 0x41b   : > { %v1414_v5 = vpop.f32.mrf.mxu3 }
 0x41c   : > { %v1415_v8 = vadd.f32 %v1414_v5, %v1352_v6 }
 0x41d   : > { %v1506_v63 = vpop.f32.mrf.mxu0 }
 0x41e   : > { %v1511_v1 = vadd.f32 %v1506_v63, %v1413_v0 }
 0x420   : > { %v1516_v9 = vmul.f32 %v2661_v4, %v1511_v1 }
 0x422   : > { %v1519_v16 = vadd.f32 %v2662_v11, %v1516_v9 }
 0x424   : > { %v1521_v20 = vmax.f32 %v1519_v16, 0.0 }
 0x425   : > { %v1508_v13 = vpop.f32.mrf.mxu0 }
 0x426   : > { %v1512_v15 = vadd.f32 %v1508_v13, %v1415_v8 }
 0x428   : > { %v1517_v17 = vmul.f32 %v2661_v4, %v1512_v15 }
 0x42a   : > { %v1520_v19 = vadd.f32 %v2662_v11, %v1517_v17 }
 0x42c   : > { %v1522_v21 = vmax.f32 %v1520_v19, 0.0 }
 0x42e   : > { %v1523_v23 = vpack.c.bf16 %v1522_v21, %v1521_v20 }
 0x430   : > { %1531 = vmatpush.bf16.msra.mxu1 %v1523_v23  ;;  %1628 = vmatmul.bf16.vlgmr.msra.gmra.mxu2 %v1523_v23 }
 0x433   : > { %2393 = vmatmul.msk.bf16.vlgmr.msra.gmra.mxu1 %vm401_vm0, %v2748_v2  ;;  %v2645_v2 = vld [vmem:[%s3182_s8 + $0xa8] sm:$0xff] }
 0x434   : > { %1703 = vmatpush.bf16.msrb.mxu1 %v1523_v23  ;;  %1778 = vmatpush.bf16.msra.mxu0 %v2645_v2 }
 0x438   : > { %1779 = vmatpush.bf16.msra.mxu0 %v2644_v28 }
 0x43c   : > { %1780 = vmatpush.bf16.msra.mxu0 %v2643_v29 }
 0x440   : > { %1781 = vmatpush.bf16.msra.mxu0 %v2642_v30 }
 0x443   : > { %2474 = vmatmul.msk.bf16.vlgmr.msrb.gmra.mxu1 %vm401_vm0, %v2753_v3  ;;  %v2624_v3 = vld [vmem:[%s3182_s8] sm:$0xff] }
 0x444   : > { %1689 = vmatpush.bf16.msrb.mxu3 %v2624_v3  ;;  %1782 = vmatpush.bf16.msra.mxu0 %v2641_v31 }
 0x448   : > { %1783 = vmatpush.bf16.msra.mxu0 %v2640_v32 }
 0x4b0   : > { %v1533_v35 = vpop.f32.mrf.mxu1 }
 0x4b3   : > { %v1629_v42 = vpop.f32.mrf.mxu2 }
 0x4b8   : > { %v1535_v36 = vpop.f32.mrf.mxu1 }
 0x4b9   : > { %v1538_v37 = vpack.c.bf16 %v1535_v36, %v1533_v35 }
 0x4bb   : > { %1690 = vmatmul.bf16.vlgmr.msrb.gmra.mxu3 %v1538_v37  ;;  %v1631_v51 = vpop.f32.mrf.mxu2 }
 0x4c0   : > { %v1705_v38 = vpop.f32.mrf.mxu1 }
 0x4c8   : > { %v1707_v39 = vpop.f32.mrf.mxu1 }
 0x4c9   : > { %v1710_v40 = vpack.c.bf16 %v1707_v39, %v1705_v38 }
 0x4cb   : > { %1784 = vmatmul.bf16.vlgmr.msra.gmra.mxu0 %v1710_v40 }
 0x53e   : > { %v1691_v41 = vpop.f32.mrf.mxu3 }
 0x53f   : > { %v1692_v43 = vadd.f32 %v1691_v41, %v1629_v42 }
 0x546   : > { %v1693_v49 = vpop.f32.mrf.mxu3 }
 0x547   : > { %v1694_v52 = vadd.f32 %v1693_v49, %v1631_v51 }
 0x548   : > { %v1785_v45 = vpop.f32.mrf.mxu0 }
 0x549   : > { %v1790_v46 = vadd.f32 %v1785_v45, %v1692_v43 }
 0x54b   : > { %v1795_v48 = vmul.f32 %v2663_v44, %v1790_v46 }
 0x54d   : > { %v1798_v50 = vadd.f32 %v2664_v47, %v1795_v48 }
 0x54f   : > { %v1800_v53 = vmax.f32 %v1798_v50, 0.0 }
 0x550   : > { %v1787_v54 = vpop.f32.mrf.mxu0 }
 0x551   : > { %v1802_v55 = vadd.f32 %v1800_v53, %v3031_v33  ;;  %v1791_v56 = vadd.f32 %v1787_v54, %v1694_v52 }
 0x553   : > { %1804 = vst [vmem:[%s379_s27] sm:$0xff] %v1802_v55  ;;  %v1796_v57 = vmul.f32 %v2663_v44, %v1791_v56 }
 0x555   : > { %v1799_v58 = vadd.f32 %v2664_v47, %v1796_v57 }
 0x557   : > { %v1801_v59 = vmax.f32 %v1799_v58, 0.0 }
 0x559   : > { %v1803_v60 = vadd.f32 %v1801_v59, %v3033_v34 }
 0x55b   : > { %1805 = vst [vmem:[%s379_s27 + $0x8] sm:$0xff] %v1803_v60 }
 0x55c PF: > { %s20_s13 = sadd.s32 1, %s2671_s13  }
 0x55d   : > { %p17_p4 = scmp.ge.s32.totalorder %s20_s13, 4  }
 0x55f   :  { %19 = sbr.rel (!%p17_p4) target bundleno = 1 (0x1), region = 104 }

</bundles_post_ra>
